<compile_context>
chip_gen: v5e
topology: v5e:2x2
jax: 0.10.0
libtpu: 0.0.40
codegen_flags: <defaults>
</compile_context>

<pallas_src>
import functools

import jax
import jax.numpy as jnp
from jax.experimental import pallas as pl
from jax.experimental.pallas import tpu as pltpu


def _round_up(x, m):
    return ((x + m - 1) // m) * m


# ----------------------------- kernels ------------------------------------ #

def _unembed_kernel_fused(x_ref, w_ref, b_ref, o_ref):
    # Full-depth contraction in a single MXU call; bias folded into epilogue.
    o_ref[...] = (
        jnp.dot(x_ref[...], w_ref[...], preferred_element_type=jnp.float32)
        + b_ref[...]
    ).astype(o_ref.dtype)


def _unembed_kernel_ksplit(x_ref, w_ref, b_ref, o_ref, acc_ref):
    # Fallback for very large d_model: accumulate over the (last) k grid axis.
    k = pl.program_id(2)

    @pl.when(k == 0)
    def _():
        acc_ref[...] = jnp.zeros_like(acc_ref)

    acc_ref[...] += jnp.dot(
        x_ref[...], w_ref[...], preferred_element_type=jnp.float32
    )

    @pl.when(k == pl.num_programs(2) - 1)
    def _():
        o_ref[...] = (acc_ref[...] + b_ref[...]).astype(o_ref.dtype)


# --------------------------- tile selection -------------------------------- #

_VMEM_LIMIT_BYTES = 64 * 1024 * 1024   # explicit scoped-VMEM limit (<= v7x physical)
_VMEM_TILE_BUDGET = 44 * 1024 * 1024   # double-buffered tiles kept under this


def _tile_bytes(tm, tk, tn, in_itemsize, out_itemsize, with_acc):
    # Double-buffered x, W, b inputs + double-buffered output (+ f32 acc).
    b = 2 * (tm * tk + tk * tn + tn) * in_itemsize + 2 * tm * tn * out_itemsize
    if with_acc:
        b += tm * tn * 4
    return b


def _select_tiles(M, K, V, in_itemsize, out_itemsize):
    k_full = _round_up(K, 128)
    tm = min(256, _round_up(M, 8))          # multiple of 8 (sublane)
    tn = min(1024, _round_up(V, 128))       # multiple of 128 (lane-dense stores)
    tk = k_full                             # full contraction if it fits

    def fits():
        return _tile_bytes(
            tm, tk, tn, in_itemsize, out_itemsize, tk < k_full
        ) <= _VMEM_TILE_BUDGET

    while not fits():
        if tn > 256:
            tn //= 2
        elif tk > 512:
            tk = _round_up(tk // 2, 128)
        elif tm > 64:
            tm = _round_up(tm // 2, 8)
        else:
            break
    return tm, tk, tn, tk < k_full


# ------------------------------ wrapper ------------------------------------ #

@functools.partial(jax.jit, static_argnames=("compute_dtype",))
def unembed(x, W_U, b_U, *, compute_dtype=None):
    """x: [batch, position, d_model] -> logits [batch, position, d_vocab]."""
    batch, position, d_model = x.shape
    d_model_w, d_vocab = W_U.shape
    assert d_model == d_model_w
    M = batch * position

    out_dtype = x.dtype
    in_dtype = compute_dtype if compute_dtype is not None else x.dtype
    in_itemsize = jnp.dtype(in_dtype).itemsize
    out_itemsize = jnp.dtype(out_dtype).itemsize

    tm, tk, tn, split_k = _select_tiles(M, d_model, d_vocab, in_itemsize, out_itemsize)

    # Pad every dim to a tile multiple (zeros are exact for matmul + bias).
    M_pad = _round_up(M, tm)
    K_pad = _round_up(d_model, tk)
    V_pad = _round_up(d_vocab, tn)

    x2d = x.reshape(M, d_model)
    if compute_dtype is not None:
        x2d = x2d.astype(compute_dtype)
        W_U = W_U.astype(compute_dtype)
    if (M_pad, K_pad) != (M, d_model):
        x2d = jnp.pad(x2d, ((0, M_pad - M), (0, K_pad - d_model)))
    Wp = W_U
    if (K_pad, V_pad) != (d_model, d_vocab):
        Wp = jnp.pad(Wp, ((0, K_pad - d_model), (0, V_pad - d_vocab)))
    b2d = b_U.reshape(1, d_vocab).astype(jnp.float32)
    if V_pad != d_vocab:
        b2d = jnp.pad(b2d, ((0, 0), (0, V_pad - d_vocab)))

    grid_m = M_pad // tm
    grid_n = V_pad // tn

    cost = pl.CostEstimate(
        flops=2 * M_pad * K_pad * V_pad,
        transcendentals=0,
        bytes_accessed=(
            M_pad * K_pad * in_itemsize
            + K_pad * V_pad * in_itemsize
            + V_pad * 4
            + M_pad * V_pad * out_itemsize
        ),
    )

    if not split_k:
        # Pick the grid-axis order minimizing HBM bytes re-streamed.
        #   m-outer: x read once,          W_U read grid_m times.
        #   n-outer: W_U read once (index constant over the inner m sweep so
        #            Pallas skips the refetch), x read grid_n times.
        bytes_m_outer = M_pad * K_pad + grid_m * K_pad * V_pad
        bytes_n_outer = K_pad * V_pad + grid_n * M_pad * K_pad
        if bytes_m_outer <= bytes_n_outer:
            grid = (grid_m, grid_n)
            x_spec = pl.BlockSpec((tm, tk), lambda i, j: (i, 0))
            w_spec = pl.BlockSpec((tk, tn), lambda i, j: (0, j))
            b_spec = pl.BlockSpec((1, tn), lambda i, j: (0, j))
            o_spec = pl.BlockSpec((tm, tn), lambda i, j: (i, j))
        else:
            grid = (grid_n, grid_m)
            x_spec = pl.BlockSpec((tm, tk), lambda j, i: (i, 0))
            w_spec = pl.BlockSpec((tk, tn), lambda j, i: (0, j))
            b_spec = pl.BlockSpec((1, tn), lambda j, i: (0, j))
            o_spec = pl.BlockSpec((tm, tn), lambda j, i: (i, j))

        out2d = pl.pallas_call(
            _unembed_kernel_fused,
            out_shape=jax.ShapeDtypeStruct((M_pad, V_pad), out_dtype),
            grid_spec=pltpu.PrefetchScalarGridSpec(
                num_scalar_prefetch=0,
                grid=grid,
                in_specs=[x_spec, w_spec, b_spec],
                out_specs=o_spec,
            ),
            compiler_params=pltpu.CompilerParams(
                dimension_semantics=("parallel", "parallel"),
                vmem_limit_bytes=_VMEM_LIMIT_BYTES,
            ),
            cost_estimate=cost,
        )(x2d, Wp, b2d)
    else:
        # Fallback: split the contraction; reduction axis last, f32 acc in VMEM.
        grid = (grid_m, grid_n, K_pad // tk)
        out2d = pl.pallas_call(
            _unembed_kernel_ksplit,
            out_shape=jax.ShapeDtypeStruct((M_pad, V_pad), out_dtype),
            grid_spec=pltpu.PrefetchScalarGridSpec(
                num_scalar_prefetch=0,
                grid=grid,
                in_specs=[
                    pl.BlockSpec((tm, tk), lambda i, j, k: (i, k)),
                    pl.BlockSpec((tk, tn), lambda i, j, k: (k, j)),
                    pl.BlockSpec((1, tn), lambda i, j, k: (0, j)),
                ],
                out_specs=pl.BlockSpec((tm, tn), lambda i, j, k: (i, j)),
                scratch_shapes=[pltpu.VMEM((tm, tn), jnp.float32)],
            ),
            compiler_params=pltpu.CompilerParams(
                dimension_semantics=("parallel", "parallel", "arbitrary"),
                vmem_limit_bytes=_VMEM_LIMIT_BYTES,
            ),
            cost_estimate=cost,
        )(x2d, Wp, b2d)

    out2d = out2d[:M, :d_vocab]
    return out2d.reshape(batch, position, d_vocab)


# ------------------------------- main -------------------------------------- #

if __name__ == "__main__":
    # Small config consistent with the module: d_model=32, d_vocab=256,
    # batch=2, position=8, init_range=0.02.
    batch, position, d_model, d_vocab = 2, 8, 32, 256
    init_range = 0.02

    key = jax.random.PRNGKey(0)
    kx, kw = jax.random.split(key)

    x = jax.random.normal(kx, (batch, position, d_model), dtype=jnp.float32)
    W_U = init_range * jax.random.normal(kw, (d_model, d_vocab), dtype=jnp.float32)
    b_U = jnp.zeros((d_vocab,), dtype=jnp.float32)  # module init: zeros

    out = unembed(x, W_U, b_U)
    out = jax.block_until_ready(out)
    ref = jnp.einsum("bpd,dv->bpv", x, W_U) + b_U
    assert out.shape == (batch, position, d_vocab)
    assert jnp.allclose(out, ref, atol=1e-5, rtol=1e-5)

    # Non-divisible shapes exercise the padding / slicing path.
    x2 = jax.random.normal(kx, (3, 7, d_model), dtype=jnp.float32)
    out2 = jax.block_until_ready(unembed(x2, W_U, b_U))
    ref2 = jnp.einsum("bpd,dv->bpv", x2, W_U) + b_U
    assert out2.shape == (3, 7, d_vocab)
    assert jnp.allclose(out2, ref2, atol=1e-5, rtol=1e-5)

    # Non-zero bias exercises the fused bias-add path.
    b_test = 0.1 * jnp.arange(d_vocab, dtype=jnp.float32)
    out3 = jax.block_until_ready(unembed(x, W_U, b_test))
    ref3 = jnp.einsum("bpd,dv->bpv", x, W_U) + b_test
    assert jnp.allclose(out3, ref3, atol=1e-5, rtol=1e-5)

    print("KERNEL_OK")
</pallas_src>

<mosaic_0001>
module attributes {stable_mosaic.version = 11 : i64} {
  func.func @_unembed_kernel_fused(%arg0: i32, %arg1: i32, %arg2: memref<16x128xf32, #tpu.memory_space<vmem>>, %arg3: memref<128x256xf32, #tpu.memory_space<vmem>>, %arg4: memref<1x256xf32, #tpu.memory_space<vmem>>, %arg5: memref<16x256xf32, #tpu.memory_space<vmem>>) attributes {dimension_semantics = [#tpu.dimension_semantics<parallel>, #tpu.dimension_semantics<parallel>], iteration_bounds = array<i64: 1, 1>, scalar_prefetch = 0 : i64, scratch_operands = 0 : i64, tpu.core_type = #tpu.core_type<tc>, window_params = [{transform_indices = @transform_0, window_bounds = array<i64: 16, 128>}, {transform_indices = @transform_1, window_bounds = array<i64: 128, 256>}, {transform_indices = @transform_2, window_bounds = array<i64: 1, 256>}, {transform_indices = @transform_3, window_bounds = array<i64: 16, 256>}]} {
    %c0 = arith.constant 0 : index
    %c0_0 = arith.constant 0 : index
    %0 = vector.load %arg2[%c0, %c0_0] : memref<16x128xf32, #tpu.memory_space<vmem>>, vector<16x128xf32>
    %c0_1 = arith.constant 0 : index
    %c0_2 = arith.constant 0 : index
    %1 = vector.load %arg3[%c0_1, %c0_2] : memref<128x256xf32, #tpu.memory_space<vmem>>, vector<128x256xf32>
    %cst = arith.constant dense<0.000000e+00> : vector<16x256xf32>
    %2 = tpu.matmul %0, %1, %cst {dimension_numbers = #tpu.dot_dimension_numbers<[1], [0], [0], [1], [0, 0, 1, 1], [], []>} : vector<16x128xf32>, vector<128x256xf32>, vector<16x256xf32> -> vector<16x256xf32>
    %c0_3 = arith.constant 0 : index
    %c0_4 = arith.constant 0 : index
    %3 = vector.load %arg4[%c0_3, %c0_4] : memref<1x256xf32, #tpu.memory_space<vmem>>, vector<1x256xf32>
    %4 = vector.broadcast %3 : vector<1x256xf32> to vector<16x256xf32>
    %5 = arith.addf %2, %4 : vector<16x256xf32>
    %c0_5 = arith.constant 0 : index
    %c0_6 = arith.constant 0 : index
    %6 = vector.load %arg5[%c0_5, %c0_6] : memref<16x256xf32, #tpu.memory_space<vmem>>, vector<16x256xf32>
    tpu.vector_store %arg5[%c0_5, %c0_6], %5 {strides = array<i32>} : memref<16x256xf32, #tpu.memory_space<vmem>>, vector<16x256xf32>,
    return
  }
  func.func @transform_0(%arg0: i32, %arg1: i32) -> (i32, i32) {
    %c0_i32 = arith.constant 0 : i32
    %c0_i32_0 = arith.constant 0 : i32
    return %arg0, %c0_i32 : i32, i32
  }
  func.func @transform_1(%arg0: i32, %arg1: i32) -> (i32, i32) {
    %c0_i32 = arith.constant 0 : i32
    %c0_i32_0 = arith.constant 0 : i32
    return %c0_i32, %arg1 : i32, i32
  }
  func.func @transform_2(%arg0: i32, %arg1: i32) -> (i32, i32) {
    %c0_i32 = arith.constant 0 : i32
    %c0_i32_0 = arith.constant 0 : i32
    return %c0_i32, %arg1 : i32, i32
  }
  func.func @transform_3(%arg0: i32, %arg1: i32) -> (i32, i32) {
    %c0_i32 = arith.constant 0 : i32
    return %arg0, %arg1 : i32, i32
  }
}

</mosaic_0001>

<bundles_post_ra>
// kernel: unembed.1
= control target key start
LH: loop header
LB: loop body
LE: loop exit
PB: predicated region body
PF: predicated region fallthrough
CT: control target
= control target key end

     0   :  { %s315_s0 = inlined_call_operand.vmem [shape: f32[16,128], index: 0, kind: input, shape index: {}]   ;;  %s316_s1 = inlined_call_operand.vmem [shape: f32[128,256], index: 1, kind: input, shape index: {}]   ;;  %s317_s2 = inlined_call_operand.vmem [shape: f32[1,256], index: 2, kind: input, shape index: {}]   ;;  %s318_s3 = inlined_call_operand.hbm [shape: f32[16,256], index: 3, kind: output, shape index: {}]  }
   0x1   :  { %v47_v0 = vld [vmem:[%s316_s1 + $0xf0] sm:$0xff]  ;;  %v48_v1 = vld [vmem:[%s316_s1 + $0xf8] sm:$0xff]  ;;  %v45_v2 = vld [vmem:[%s316_s1 + $0xe0] sm:$0xff] }
   0x2   :  { %123 = vmatpush.msra.mxu2 %v47_v0  ;;  %139 = vmatpush.msra.mxu3 %v48_v1  ;;  %v46_v3 = vld [vmem:[%s316_s1 + $0xe8] sm:$0xff]  ;;  %v43_v4 = vld [vmem:[%s316_s1 + $0xd0] sm:$0xff]  ;;  %v44_v5 = vld [vmem:[%s316_s1 + $0xd8] sm:$0xff] }
   0x3   :  { %55 = vmatpush.msra.mxu0 %v47_v0  ;;  %78 = vmatpush.msra.mxu1 %v48_v1  ;;  %v41_v6 = vld [vmem:[%s316_s1 + $0xc0] sm:$0xff]  ;;  %v42_v7 = vld [vmem:[%s316_s1 + $0xc8] sm:$0xff]  ;;  %v39_v8 = vld [vmem:[%s316_s1 + $0xb0] sm:$0xff] }
   0x4   :  { %124 = vmatpush.msra.mxu2 %v45_v2  ;;  %140 = vmatpush.msra.mxu3 %v46_v3  ;;  %v40_v9 = vld [vmem:[%s316_s1 + $0xb8] sm:$0xff]  ;;  %v37_v10 = vld [vmem:[%s316_s1 + $0xa0] sm:$0xff]  ;;  %v38_v11 = vld [vmem:[%s316_s1 + $0xa8] sm:$0xff] }
   0x5   :  { %56 = vmatpush.msra.mxu0 %v45_v2  ;;  %79 = vmatpush.msra.mxu1 %v46_v3  ;;  %v35_v12 = vld [vmem:[%s316_s1 + $0x90] sm:$0xff]  ;;  %v36_v13 = vld [vmem:[%s316_s1 + $0x98] sm:$0xff] }
   0x6   :  { %125 = vmatpush.msra.mxu2 %v43_v4  ;;  %141 = vmatpush.msra.mxu3 %v44_v5 }
   0x7   :  { %57 = vmatpush.msra.mxu0 %v43_v4  ;;  %80 = vmatpush.msra.mxu1 %v44_v5 }
   0x8   :  { %126 = vmatpush.msra.mxu2 %v41_v6  ;;  %142 = vmatpush.msra.mxu3 %v42_v7 }
   0x9   :  { %58 = vmatpush.msra.mxu0 %v41_v6  ;;  %81 = vmatpush.msra.mxu1 %v42_v7 }
   0xa   :  { %127 = vmatpush.msra.mxu2 %v39_v8  ;;  %143 = vmatpush.msra.mxu3 %v40_v9 }
   0xb   :  { %59 = vmatpush.msra.mxu0 %v39_v8  ;;  %82 = vmatpush.msra.mxu1 %v40_v9 }
   0xc   :  { %128 = vmatpush.msra.mxu2 %v37_v10  ;;  %144 = vmatpush.msra.mxu3 %v38_v11 }
   0xd   :  { %8 = vsyncpa [#allocation3], 0  ;;  %v33_v14 = vld [vmem:[%s316_s1 + $0x80] sm:$0xff]  ;;  %v34_v15 = vld [vmem:[%s316_s1 + $0x88] sm:$0xff]  ;;  %60 = vmatpush.msra.mxu0 %v37_v10  ;;  %83 = vmatpush.msra.mxu1 %v38_v11  ;;  %s184_s27 = smov [#allocation2]   ;;  %s111_s30 = sshll.u32 %s318_s3, 4  ;;  %s112_s30 = int_to_ptr.hbm [resolvable:$true] %s111_s30 }
   0xe   :  { %129 = vmatpush.msra.mxu2 %v35_v12  ;;  %145 = vmatpush.msra.mxu3 %v36_v13  ;;  %v31_v16 = vld [vmem:[%s316_s1 + $0x70] sm:$0xff]  ;;  %v32_v17 = vld [vmem:[%s316_s1 + $0x78] sm:$0xff]  ;;  %v29_v18 = vld [vmem:[%s316_s1 + $0x60] sm:$0xff]  ;;  %s109_s28 = sshll.u32 %s184_s27, 4  ;;  %s186_s4 = smov 16   ;;  %s110_s28 = int_to_ptr.vmem [resolvable:$true] %s109_s28 }
   0xf   :  { %61 = vmatpush.msra.mxu0 %v35_v12  ;;  %84 = vmatpush.msra.mxu1 %v36_v13  ;;  %v30_v19 = vld [vmem:[%s316_s1 + $0x68] sm:$0xff]  ;;  %v27_v20 = vld [vmem:[%s316_s1 + $0x50] sm:$0xff]  ;;  %v28_v21 = vld [vmem:[%s316_s1 + $0x58] sm:$0xff] }
  0x10   :  { %130 = vmatpush.msra.mxu2 %v33_v14  ;;  %146 = vmatpush.msra.mxu3 %v34_v15  ;;  %v25_v22 = vld [vmem:[%s316_s1 + $0x40] sm:$0xff]  ;;  %v26_v23 = vld [vmem:[%s316_s1 + $0x48] sm:$0xff]  ;;  %v23_v24 = vld [vmem:[%s316_s1 + $0x30] sm:$0xff] }
  0x11   :  { %62 = vmatpush.msra.mxu0 %v33_v14  ;;  %85 = vmatpush.msra.mxu1 %v34_v15  ;;  %v24_v25 = vld [vmem:[%s316_s1 + $0x38] sm:$0xff]  ;;  %v21_v26 = vld [vmem:[%s316_s1 + $0x20] sm:$0xff]  ;;  %v22_v27 = vld [vmem:[%s316_s1 + $0x28] sm:$0xff] }
  0x12   :  { %131 = vmatpush.msra.mxu2 %v31_v16  ;;  %147 = vmatpush.msra.mxu3 %v32_v17  ;;  %v19_v28 = vld [vmem:[%s316_s1 + $0x10] sm:$0xff]  ;;  %v20_v29 = vld [vmem:[%s316_s1 + $0x18] sm:$0xff]  ;;  %v17_v30 = vld [vmem:[%s316_s1] sm:$0xff] }
  0x13   :  { %63 = vmatpush.msra.mxu0 %v31_v16  ;;  %86 = vmatpush.msra.mxu1 %v32_v17  ;;  %v18_v31 = vld [vmem:[%s316_s1 + $0x8] sm:$0xff]  ;;  %v15_v33 = vld [vmem:[%s315_s0] sm:$0xff] }
  0x14   :  { %132 = vmatpush.msra.mxu2 %v29_v18  ;;  %148 = vmatpush.msra.mxu3 %v30_v19  ;;  %v16_v32 = vld [vmem:[%s315_s0 + $0x8] sm:$0xff]  ;;  %v49_v34 = vld [vmem:[%s317_s2] sm:$0x3]  ;;  %s185_s2 = smov 256  }
  0x15   :  { %64 = vmatpush.msra.mxu0 %v29_v18  ;;  %87 = vmatpush.msra.mxu1 %v30_v19  ;;  %v51_v35 = vperm.slane %v49_v34, 0  ;;  %v52_v36 = vperm.slane %v49_v34, 1 }
  0x16   :  { %133 = vmatpush.msra.mxu2 %v27_v20  ;;  %149 = vmatpush.msra.mxu3 %v28_v21 }
  0x17   :  { %65 = vmatpush.msra.mxu0 %v27_v20  ;;  %88 = vmatpush.msra.mxu1 %v28_v21 }
  0x18   :  { %134 = vmatpush.msra.mxu2 %v25_v22  ;;  %150 = vmatpush.msra.mxu3 %v26_v23 }
  0x19   :  { %66 = vmatpush.msra.mxu0 %v25_v22  ;;  %89 = vmatpush.msra.mxu1 %v26_v23 }
  0x1a   :  { %135 = vmatpush.msra.mxu2 %v23_v24  ;;  %151 = vmatpush.msra.mxu3 %v24_v25 }
  0x1b   :  { %67 = vmatpush.msra.mxu0 %v23_v24  ;;  %90 = vmatpush.msra.mxu1 %v24_v25 }
  0x1c   :  { %136 = vmatpush.msra.mxu2 %v21_v26  ;;  %152 = vmatpush.msra.mxu3 %v22_v27 }
  0x1d   :  { %68 = vmatpush.msra.mxu0 %v21_v26  ;;  %91 = vmatpush.msra.mxu1 %v22_v27 }
  0x1e   :  { %137 = vmatpush.msra.mxu2 %v19_v28  ;;  %153 = vmatpush.msra.mxu3 %v20_v29 }
  0x1f   :  { %69 = vmatpush.msra.mxu0 %v19_v28  ;;  %92 = vmatpush.msra.mxu1 %v20_v29 }
  0x20   :  { %138 = vmatpush.msra.mxu2 %v17_v30  ;;  %154 = vmatpush.msra.mxu3 %v18_v31 }
  0x21   :  { %74 = vmatmul.f32.vlgmr.msra.gmra.mxu2 %v16_v32  ;;  %97 = vmatmul.f32.vlgmr.msra.gmra.mxu3 %v16_v32 }
  0x22   :  { %70 = vmatpush.msra.mxu0 %v17_v30  ;;  %93 = vmatpush.msra.mxu1 %v18_v31 }
  0x23   :  { %71 = vmatmul.f32.vlgmr.msra.gmra.mxu0 %v15_v33  ;;  %94 = vmatmul.f32.vlgmr.msra.gmra.mxu1 %v15_v33 }
  0xa0   :  { %v72_v37 = vpop.f32.mrf.mxu0  ;;  %v95_v38 = vpop.f32.mrf.mxu1 }
  0xa1   :  { %v73_v39 = vadd.f32 %v72_v37, %v51_v35  ;;  %v96_v40 = vadd.f32 %v95_v38, %v52_v36 }
  0xa3   :  { %101 = vst [vmem:[#allocation2] sm:$0xff] %v73_v39 }
  0xa4   :  { %v75_v41 = vpop.f32.mrf.mxu2  ;;  %102 = vst [vmem:[#allocation2 + $0x8] sm:$0xff] %v96_v40  ;;  %v98_v42 = vpop.f32.mrf.mxu3 }
  0xa5   :  { %v76_v43 = vadd.f32 %v75_v41, %v51_v35  ;;  %v99_v44 = vadd.f32 %v98_v42, %v52_v36 }
  0xa7   :  { %103 = vst [vmem:[#allocation2 + $0x10] sm:$0xff] %v76_v43 }
  0xa8   :  { %104 = vst [vmem:[#allocation2 + $0x18] sm:$0xff] %v99_v44 }
  0xa9   :  { %117 = dma.vmem_to_hbm [thread:$0]  %s110_s28, 512, %s112_s30, [#allocation3], %s185_s2, %s185_s2, %s186_s4  }
  0xaa   :  { %182 = dma.done.wait [#allocation3], 512  }
  0xab   :  { %183 = vsyncadd [#allocation3], 4294966784 }
  0xac   :  { %122 = vsyncpa [#allocation3], 1 }

</bundles_post_ra>
